<compile_context>
chip_gen: v6e
topology: v6e:2x2x1
jax: 0.10.0
libtpu: 0.0.40
codegen_flags: <defaults>
</compile_context>

<pallas_src>
import functools

import jax
import jax.numpy as jnp
from jax.experimental import pallas as pl
from jax.experimental.pallas import tpu as pltpu

LATENT_DIM = 32
HIDDEN1 = 64
HIDDEN2 = 32
LEAKY_SLOPE = 0.2
_MAX_TILE_B = 8192  # lane-dense batch tile (multiple of 128); a few MiB of VMEM


def _supports_bf16_vpu():
    """True on chips whose VALU handles bf16 (v6e/v7x); False on v5e/older."""
    try:
        kind = jax.devices()[0].device_kind.lower()
    except Exception:  # pragma: no cover - be permissive off-TPU
        return True
    for tag in ("v2", "v3", "v4", "v5"):
        if tag in kind:
            return False
    return True


def _latent_disc_kernel(x_ref, w1_ref, b1_ref, w2_ref, b2_ref, w3_ref, b3_ref,
                        o_ref, *, bf16_epilogue):
    # Batch-on-lanes layout: x block is (D, TILE_B) bf16 (batch on lane axis).
    x_t = x_ref[...]

    # Layer 1: (H1, D) @ (D, TILE_B) -> (H1, TILE_B), f32 accumulation on MXU.
    h1 = jnp.dot(w1_ref[...], x_t, preferred_element_type=jnp.float32)
    if bf16_epilogue:
        # bf16 VALU epilogue (v6e/v7x): halves elementwise vreg traffic.
        h1 = h1.astype(jnp.bfloat16) + b1_ref[...]      # bias is bf16 here
        h1 = jnp.maximum(h1, LEAKY_SLOPE * h1)          # LeakyReLU, 2 VPU ops
        h1_in = h1                                      # already bf16 for MXU
    else:
        h1 = h1 + b1_ref[...]                           # f32 path (v5e-safe)
        h1 = jnp.maximum(h1, LEAKY_SLOPE * h1)
        h1_in = h1.astype(jnp.bfloat16)

    # Layer 2: (H2, H1) @ (H1, TILE_B) -> (H2, TILE_B).
    h2 = jnp.dot(w2_ref[...], h1_in, preferred_element_type=jnp.float32)
    if bf16_epilogue:
        h2 = h2.astype(jnp.bfloat16) + b2_ref[...]
    else:
        h2 = h2 + b2_ref[...]
    h2 = jnp.maximum(h2, LEAKY_SLOPE * h2)

    # Layer 3 (output width 1): VPU multiply (promotes to f32) + sublane (XLU)
    # reduce -- keeps the MXU out of the epilogue, accumulates in f32.
    logits = jnp.sum(w3_ref[...] * h2, axis=0, keepdims=True) + b3_ref[...]

    # Sigmoid: exp on EUP, approximate reciprocal on EUP (free bundle slots).
    o_ref[...] = pl.reciprocal(1.0 + jnp.exp(-logits),
                               approx=True).astype(o_ref.dtype)


def latent_discriminator(batch_data, params, *, max_tile_b=_MAX_TILE_B,
                         pre_transposed=False):
    """batch_data: (B, LATENT_DIM) f32 (or (LATENT_DIM, B) bf16 if
    pre_transposed=True) -> (B, 1) float32 probabilities."""
    w1, b1, w2, b2, w3, b3 = params
    if pre_transposed:
        D, B = batch_data.shape
        x_t = batch_data.astype(jnp.bfloat16)
    else:
        B, D = batch_data.shape
        # Layout flip + bf16 cast fused in one XLA pass: batch on lanes so
        # input loads, matmul N and output stores are all lane-dense.
        x_t = batch_data.astype(jnp.bfloat16).T                # (D, B)
    H1 = w1.shape[1]
    H2 = w2.shape[1]

    bf16_epilogue = _supports_bf16_vpu()

    # Lane-dense batch tile: multiple of 128, large enough to amortize the
    # ~0.35us per-grid-step overhead, small enough that mid-size batches still
    # produce >= 2 grid steps (so both v7x TensorCores get work).
    max_tile_b = max(128, (int(max_tile_b) // 128) * 128)
    b_pad128 = pl.cdiv(B, 128) * 128
    if b_pad128 > 128:
        target = pl.cdiv(pl.cdiv(b_pad128, 2), 128) * 128      # ~half, rounded
    else:
        target = 128
    tile_b = min(max_tile_b, target)
    b_pad = pl.cdiv(B, tile_b) * tile_b
    num_tiles = b_pad // tile_b

    if b_pad != B:
        x_t = jnp.pad(x_t, ((0, 0), (0, b_pad - B)))           # tail padding

    # Weights transposed to (out, in) bf16 for the MXU; biases follow the
    # epilogue dtype (bf16 on v6e/v7x, f32 on v5e).
    bias_dtype = jnp.bfloat16 if bf16_epilogue else jnp.float32
    w1_t = w1.T.astype(jnp.bfloat16)                           # (H1, D)
    w2_t = w2.T.astype(jnp.bfloat16)                           # (H2, H1)
    b1_c = b1.reshape(H1, 1).astype(bias_dtype)
    b2_c = b2.reshape(H2, 1).astype(bias_dtype)
    w3_c = w3.reshape(H2, 1).astype(jnp.float32)               # f32: accurate reduce
    b3_c = b3.reshape(1, 1).astype(jnp.float32)

    const = lambda i: (0, 0)
    cost = pl.CostEstimate(
        flops=2 * b_pad * (D * H1 + H1 * H2 + H2),
        transcendentals=b_pad,
        bytes_accessed=(x_t.size * 2 + b_pad * 4
                        + (w1_t.size + w2_t.size) * 2
                        + (b1_c.size + b2_c.size) * (2 if bf16_epilogue else 4)
                        + (w3_c.size + b3_c.size) * 4),
    )

    kernel = functools.partial(_latent_disc_kernel, bf16_epilogue=bf16_epilogue)

    out_t = pl.pallas_call(
        kernel,
        out_shape=jax.ShapeDtypeStruct((1, b_pad), jnp.float32),
        grid=(num_tiles,),
        in_specs=[
            pl.BlockSpec((D, tile_b), lambda i: (0, i)),   # x: streamed tiles
            pl.BlockSpec((H1, D), const),                  # weights / biases:
            pl.BlockSpec((H1, 1), const),                  # VMEM-resident,
            pl.BlockSpec((H2, H1), const),                 # DMA'd once
            pl.BlockSpec((H2, 1), const),
            pl.BlockSpec((H2, 1), const),
            pl.BlockSpec((1, 1), const),
        ],
        out_specs=pl.BlockSpec((1, tile_b), lambda i: (0, i)),  # lane-dense store
        compiler_params=pltpu.CompilerParams(
            dimension_semantics=("parallel",),   # v7x: shard tiles across 2 TCs
            vmem_limit_bytes=32 * 1024 * 1024),  # v5e default 16 MiB is tight
        cost_estimate=cost,
    )(x_t, w1_t, b1_c, w2_t, b2_c, w3_c, b3_c)

    return out_t[0, :B].reshape(B, 1)


def init_params(key):
    """Deterministic synthetic parameters (PyTorch-default-style uniform init)."""
    ks = jax.random.split(key, 6)

    def linear(kw, kb, fan_in, fan_out):
        bound = 1.0 / jnp.sqrt(fan_in)
        w = jax.random.uniform(kw, (fan_in, fan_out), jnp.float32, -bound, bound)
        b = jax.random.uniform(kb, (1, fan_out), jnp.float32, -bound, bound)
        return w, b

    w1, b1 = linear(ks[0], ks[1], LATENT_DIM, HIDDEN1)
    w2, b2 = linear(ks[2], ks[3], HIDDEN1, HIDDEN2)
    w3, b3 = linear(ks[4], ks[5], HIDDEN2, 1)
    return (w1, b1, w2, b2, w3, b3)


def _reference(batch_data, params):
    """Plain-JAX reference (matching the kernel's bf16 operand precision)."""
    w1, b1, w2, b2, w3, b3 = params
    x = batch_data.astype(jnp.bfloat16).astype(jnp.float32)
    w1 = w1.astype(jnp.bfloat16).astype(jnp.float32)
    w2 = w2.astype(jnp.bfloat16).astype(jnp.float32)
    h = x @ w1 + b1
    h = jnp.where(h > 0, h, LEAKY_SLOPE * h)
    h = h @ w2 + b2
    h = jnp.where(h > 0, h, LEAKY_SLOPE * h)
    h = h @ w3 + b3
    return jax.nn.sigmoid(h)


if __name__ == "__main__":
    key = jax.random.PRNGKey(0)
    k_params, k_data = jax.random.split(key)

    params = init_params(k_params)
    B = 8
    batch_data = jax.random.normal(k_data, (B, LATENT_DIM), jnp.float32)

    out = latent_discriminator(batch_data, params)
    out = jax.block_until_ready(out)

    ref = _reference(batch_data, params)
    assert out.shape == (B, 1)
    assert bool(jnp.all(jnp.isfinite(out)))
    assert jnp.allclose(out, ref, atol=1e-2, rtol=1e-2), float(
        jnp.max(jnp.abs(out - ref)))

    print("KERNEL_OK")
</pallas_src>

<mosaic_0001>
module attributes {stable_mosaic.version = 11 : i64} {
  func.func @_latent_disc_kernel(%arg0: i32, %arg1: memref<32x128xbf16, #tpu.memory_space<vmem>>, %arg2: memref<64x32xbf16, #tpu.memory_space<vmem>>, %arg3: memref<64x1xbf16, #tpu.memory_space<vmem>>, %arg4: memref<32x64xbf16, #tpu.memory_space<vmem>>, %arg5: memref<32x1xbf16, #tpu.memory_space<vmem>>, %arg6: memref<32x1xf32, #tpu.memory_space<vmem>>, %arg7: memref<1x1xf32, #tpu.memory_space<vmem>>, %arg8: memref<1x128xf32, #tpu.memory_space<vmem>>) attributes {dimension_semantics = [#tpu.dimension_semantics<parallel>], iteration_bounds = array<i64: 1>, scalar_prefetch = 0 : i64, scratch_operands = 0 : i64, tpu.core_type = #tpu.core_type<tc>, window_params = [{transform_indices = @transform_0, window_bounds = array<i64: 32, 128>}, {pipeline_mode = #tpu.pipeline_mode<synchronous>, transform_indices = @transform_1, window_bounds = array<i64: 64, 32>}, {pipeline_mode = #tpu.pipeline_mode<synchronous>, transform_indices = @transform_2, window_bounds = array<i64: 64, 1>}, {pipeline_mode = #tpu.pipeline_mode<synchronous>, transform_indices = @transform_3, window_bounds = array<i64: 32, 64>}, {pipeline_mode = #tpu.pipeline_mode<synchronous>, transform_indices = @transform_4, window_bounds = array<i64: 32, 1>}, {pipeline_mode = #tpu.pipeline_mode<synchronous>, transform_indices = @transform_5, window_bounds = array<i64: 32, 1>}, {pipeline_mode = #tpu.pipeline_mode<synchronous>, transform_indices = @transform_6, window_bounds = array<i64: 1, 1>}, {transform_indices = @transform_7, window_bounds = array<i64: 1, 128>}]} {
    %c0 = arith.constant 0 : index
    %c0_0 = arith.constant 0 : index
    %0 = vector.load %arg1[%c0, %c0_0] : memref<32x128xbf16, #tpu.memory_space<vmem>>, vector<32x128xbf16>
    %c0_1 = arith.constant 0 : index
    %c0_2 = arith.constant 0 : index
    %1 = vector.load %arg2[%c0_1, %c0_2] : memref<64x32xbf16, #tpu.memory_space<vmem>>, vector<64x32xbf16>
    %cst = arith.constant dense<0.000000e+00> : vector<64x128xf32>
    %2 = tpu.matmul %1, %0, %cst {dimension_numbers = #tpu.dot_dimension_numbers<[1], [0], [0], [1], [0, 0, 1, 1], [], []>} : vector<64x32xbf16>, vector<32x128xbf16>, vector<64x128xf32> -> vector<64x128xf32>
    %3 = arith.truncf %2 : vector<64x128xf32> to vector<64x128xbf16>
    %c0_3 = arith.constant 0 : index
    %c0_4 = arith.constant 0 : index
    %4 = vector.load %arg3[%c0_3, %c0_4] : memref<64x1xbf16, #tpu.memory_space<vmem>>, vector<64x1xbf16>
    %5 = vector.broadcast %4 : vector<64x1xbf16> to vector<64x128xbf16>
    %6 = arith.addf %3, %5 : vector<64x128xbf16>
    %cst_5 = arith.constant 2.001950e-01 : bf16
    %7 = vector.broadcast %cst_5 : bf16 to vector<64x128xbf16>
    %8 = arith.mulf %7, %6 : vector<64x128xbf16>
    %9 = arith.maximumf %6, %8 : vector<64x128xbf16>
    %c0_6 = arith.constant 0 : index
    %c0_7 = arith.constant 0 : index
    %10 = vector.load %arg4[%c0_6, %c0_7] : memref<32x64xbf16, #tpu.memory_space<vmem>>, vector<32x64xbf16>
    %cst_8 = arith.constant dense<0.000000e+00> : vector<32x128xf32>
    %11 = tpu.matmul %10, %9, %cst_8 {dimension_numbers = #tpu.dot_dimension_numbers<[1], [0], [0], [1], [0, 0, 1, 1], [], []>} : vector<32x64xbf16>, vector<64x128xbf16>, vector<32x128xf32> -> vector<32x128xf32>
    %12 = arith.truncf %11 : vector<32x128xf32> to vector<32x128xbf16>
    %c0_9 = arith.constant 0 : index
    %c0_10 = arith.constant 0 : index
    %13 = vector.load %arg5[%c0_9, %c0_10] : memref<32x1xbf16, #tpu.memory_space<vmem>>, vector<32x1xbf16>
    %14 = vector.broadcast %13 : vector<32x1xbf16> to vector<32x128xbf16>
    %15 = arith.addf %12, %14 : vector<32x128xbf16>
    %cst_11 = arith.constant 2.001950e-01 : bf16
    %16 = vector.broadcast %cst_11 : bf16 to vector<32x128xbf16>
    %17 = arith.mulf %16, %15 : vector<32x128xbf16>
    %18 = arith.maximumf %15, %17 : vector<32x128xbf16>
    %c0_12 = arith.constant 0 : index
    %c0_13 = arith.constant 0 : index
    %19 = vector.load %arg6[%c0_12, %c0_13] : memref<32x1xf32, #tpu.memory_space<vmem>>, vector<32x1xf32>
    %20 = arith.extf %18 : vector<32x128xbf16> to vector<32x128xf32>
    %21 = vector.broadcast %19 : vector<32x1xf32> to vector<32x128xf32>
    %22 = arith.mulf %21, %20 : vector<32x128xf32>
    %cst_14 = arith.constant dense<0.000000e+00> : vector<128xf32>
    %23 = vector.multi_reduction <add>, %22, %cst_14 [0] : vector<32x128xf32> to vector<128xf32>
    %24 = vector.shape_cast %23 : vector<128xf32> to vector<1x128xf32>
    %c0_15 = arith.constant 0 : index
    %c0_16 = arith.constant 0 : index
    %25 = vector.load %arg7[%c0_15, %c0_16] : memref<1x1xf32, #tpu.memory_space<vmem>>, vector<1x1xf32>
    %26 = vector.broadcast %25 : vector<1x1xf32> to vector<1x128xf32>
    %27 = arith.addf %24, %26 : vector<1x128xf32>
    %cst_17 = arith.constant 0.000000e+00 : f32
    %28 = vector.broadcast %cst_17 : f32 to vector<1x128xf32>
    %29 = arith.subf %28, %27 : vector<1x128xf32>
    %30 = math.exp %29 : vector<1x128xf32>
    %cst_18 = arith.constant 1.000000e+00 : f32
    %31 = vector.broadcast %cst_18 : f32 to vector<1x128xf32>
    %32 = arith.addf %31, %30 : vector<1x128xf32>
    %33 = tpu.reciprocal %32 {approx = true} : vector<1x128xf32> -> vector<1x128xf32>
    %c0_19 = arith.constant 0 : index
    %c0_20 = arith.constant 0 : index
    %34 = vector.load %arg8[%c0_19, %c0_20] : memref<1x128xf32, #tpu.memory_space<vmem>>, vector<1x128xf32>
    tpu.vector_store %arg8[%c0_19, %c0_20], %33 {strides = array<i32>} : memref<1x128xf32, #tpu.memory_space<vmem>>, vector<1x128xf32>,
    return
  }
  func.func @transform_0(%arg0: i32) -> (i32, i32) {
    %c0_i32 = arith.constant 0 : i32
    %c0_i32_0 = arith.constant 0 : i32
    return %c0_i32, %arg0 : i32, i32
  }
  func.func @transform_1(%arg0: i32) -> (i32, i32) {
    %c0_i32 = arith.constant 0 : i32
    %c0_i32_0 = arith.constant 0 : i32
    %c0_i32_1 = arith.constant 0 : i32
    return %c0_i32, %c0_i32_0 : i32, i32
  }
  func.func @transform_2(%arg0: i32) -> (i32, i32) {
    %c0_i32 = arith.constant 0 : i32
    %c0_i32_0 = arith.constant 0 : i32
    %c0_i32_1 = arith.constant 0 : i32
    return %c0_i32, %c0_i32_0 : i32, i32
  }
  func.func @transform_3(%arg0: i32) -> (i32, i32) {
    %c0_i32 = arith.constant 0 : i32
    %c0_i32_0 = arith.constant 0 : i32
    %c0_i32_1 = arith.constant 0 : i32
    return %c0_i32, %c0_i32_0 : i32, i32
  }
  func.func @transform_4(%arg0: i32) -> (i32, i32) {
    %c0_i32 = arith.constant 0 : i32
    %c0_i32_0 = arith.constant 0 : i32
    %c0_i32_1 = arith.constant 0 : i32
    return %c0_i32, %c0_i32_0 : i32, i32
  }
  func.func @transform_5(%arg0: i32) -> (i32, i32) {
    %c0_i32 = arith.constant 0 : i32
    %c0_i32_0 = arith.constant 0 : i32
    %c0_i32_1 = arith.constant 0 : i32
    return %c0_i32, %c0_i32_0 : i32, i32
  }
  func.func @transform_6(%arg0: i32) -> (i32, i32) {
    %c0_i32 = arith.constant 0 : i32
    %c0_i32_0 = arith.constant 0 : i32
    %c0_i32_1 = arith.constant 0 : i32
    return %c0_i32, %c0_i32_0 : i32, i32
  }
  func.func @transform_7(%arg0: i32) -> (i32, i32) {
    %c0_i32 = arith.constant 0 : i32
    %c0_i32_0 = arith.constant 0 : i32
    return %c0_i32, %arg0 : i32, i32
  }
}

</mosaic_0001>

<bundles_post_ra>
// kernel: tpu_custom_call.1
= control target key start
LH: loop header
LB: loop body
LE: loop exit
PB: predicated region body
PF: predicated region fallthrough
CT: control target
= control target key end

     0   :  { %s751_s0 = inlined_call_operand.vmem [shape: bf16[32,128], index: 0, kind: input, shape index: {}]   ;;  %s752_s1 = inlined_call_operand.vmem [shape: bf16[64,32], index: 1, kind: input, shape index: {}]   ;;  %s753_s2 = inlined_call_operand.vmem [shape: bf16[64,1], index: 2, kind: input, shape index: {}]   ;;  %s754_s3 = inlined_call_operand.vmem [shape: bf16[32,64], index: 3, kind: input, shape index: {}]   ;;  %s755_s4 = inlined_call_operand.vmem [shape: bf16[32,1], index: 4, kind: input, shape index: {}]   ;;  %s756_s5 = inlined_call_operand.vmem [shape: f32[32,1], index: 5, kind: input, shape index: {}]   ;;  %s757_s6 = inlined_call_operand.<no memory space> [shape: f32[1,1], index: 6, kind: input, shape index: {}]   ;;  %s758_s7 = inlined_call_operand.hbm [shape: f32[1,128], index: 7, kind: output, shape index: {}]  }
   0x1   :  { %v12_v0 = vstv %s757_s6 }
   0x2   :  { %13 = vst [vmem:[#allocation2] sm:$0x1] %v12_v0 }
   0x3   :  { %v572_v1 = vld [vmem:[%s751_s0 + $0x8] sm:$0xff]   ;;  %vm75_vm0 = vcmask 261120   ;;  %v573_v2 = vld [vmem:[%s751_s0] sm:$0xff]   ;;  %v606_v4 = vmov 0   ;;  %v163_v6 = vld [vmem:[%s753_s2 + $0x18] sm:$0xf] }
   0x4   :  { %543 = vmatprep.subr.bf16.mxu0 %v572_v1  ;;  %v574_v3 = vld [vmem:[%s752_s1] sm:$0xff]   ;;  %570 = vset.pattern.permute.xlu0 %v606_v4  ;;  %v575_v5 = vld [vmem:[%s752_s1 + $0x8] sm:$0xff]   ;;  %v161_v7 = vld [vmem:[%s753_s2 + $0x10] sm:$0xf] }
   0x5   :  { %544 = vmatpush3.bf16.msra.mxu0 %v572_v1  ;;  %571 = vset.pattern.permute.xlu1 %v606_v4  ;;  %v576_v8 = vld [vmem:[%s752_s1 + $0x10] sm:$0xff]   ;;  %v164_v9 = vld [vmem:[%s753_s2 + $0x1c] sm:$0xf]  ;;  %v159_v11 = vld [vmem:[%s753_s2 + $0x8] sm:$0xf] }
   0x6   :  { %545 = vmatprep.subr.bf16.mxu0 %v573_v2  ;;  %547 = vmatprep.mubr.msk.bf16.mxu0 %vm75_vm0, %v574_v3  ;;  %v162_v10 = vld [vmem:[%s753_s2 + $0x14] sm:$0xf]  ;;  %v160_v12 = vld [vmem:[%s753_s2 + $0xc] sm:$0xf] }
   0x7   :  { %239 = vperm.xlu0 %570, %v163_v6   ;;  %215 = vperm.xlu1 %571, %v161_v7  }
   0x9   :  { %546 = vmatpush3.bf16.msra.mxu0 %v573_v2 }
   0xb   :  { %251 = vperm.xlu0 %570, %v164_v9   ;;  %227 = vperm.xlu1 %571, %v162_v10  }
   0xc   :  { %548 = vmatmul.mubr.msk.bf16.vlgmr.msra.gmra.mxu0 %vm75_vm0, %v575_v5 }
   0xd   :  { %551 = vmatprep.mubr.msk.bf16.mxu0 %vm75_vm0, %v576_v8 }
   0xe   :  { %14 = vsyncpa [#allocation4], 0  ;;  %v577_v13 = vld [vmem:[%s752_s1 + $0x18] sm:$0xff]   ;;  %v157_v14 = vld [vmem:[%s753_s2] sm:$0xf]  ;;  %vm311_vm1 = vcmask 523264   ;;  %v173_v30 = vlaneseq }
   0xf   :  { %191 = vperm.xlu0 %570, %v159_v11   ;;  %203 = vperm.xlu1 %571, %v160_v12   ;;  %v158_v15 = vld [vmem:[%s753_s2 + $0x4] sm:$0xf]  ;;  %v369_v16 = vld [vmem:[%s755_s4] sm:$0xf]  ;;  %v371_v18 = vld [vmem:[%s755_s4 + $0x8] sm:$0xf] }
  0x10   :  { %v370_v17 = vld [vmem:[%s755_s4 + $0x4] sm:$0xf]  ;;  %v372_v19 = vld [vmem:[%s755_s4 + $0xc] sm:$0xf]  ;;  %v441_v22 = vld [vmem:[%s756_s5 + $0x10] sm:$0xff]  ;;  %v726_v35 = vshrl.u32 %v173_v30, 7 }
  0x11   :  { %v439_v20 = vld [vmem:[%s756_s5] sm:$0xff]  ;;  %v440_v21 = vld [vmem:[%s756_s5 + $0x8] sm:$0xff]  ;;  %v442_v23 = vld [vmem:[%s756_s5 + $0x18] sm:$0xff]  ;;  %v607_v28 = vmov 839922192  }
  0x12   :  { %v480_v24 = vld [vmem:[#allocation2] sm:$0x1]  ;;  %v171_v29 = vunpack.c.l.s4 %v607_v28  ;;  %v579_v12 = vld [vmem:[%s754_s3 + $0x8] sm:$0xff]  }
  0x13   :  { %167 = vperm.xlu0 %570, %v157_v14   ;;  %179 = vperm.xlu1 %571, %v158_v15   ;;  %v578_v25 = vld [vmem:[%s754_s3] sm:$0xff]   ;;  %s608_s3 = smov [#allocation3]  }
  0x14   :  { %552 = vmatmul.mubr.msk.bf16.gmra.mxu0 %vm75_vm0, %v577_v13  ;;  %563 = vmatprep.mubr.msk.bf16.mxu1 %vm311_vm1, %v578_v25  ;;  %v172_v34 = vunpack.c.0.s8 %v171_v29  ;;  %s503_s20 = sshll.u32 %s608_s3, 4  ;;  %s504_s20 = int_to_ptr.vmem [resolvable:$true] %s503_s20 }
  0x15   :  { %s584_s21 = scalar_lea.vmem %s504_s20, 16  ;;  %s588_s22 = scalar_lea.vmem %s504_s20, 32 }
  0x16   :  { %v729_v38 = vsub.s32 %v172_v34, %v726_v35  ;;  %p585_p0 = scmp.ne.s32.totalorder %s504_s20, %s584_s21  ;;  %p589_p1 = scmp.lt.s32.totalorder %s504_s20, %s504_s20 }
  0x17   :  { %375 = vperm.xlu0 %570, %v369_v16   ;;  %387 = vperm.xlu1 %571, %v370_v17   ;;  %p590_p2 = scmp.lt.s32.totalorder %s588_s22, %s584_s21 }
  0x19   :  { %p591_p3 = por %p590_p2, %p589_p1 }
  0x1b   :  { %399 = vperm.xlu0 %570, %v371_v18   ;;  %411 = vperm.xlu1 %571, %v372_v19   ;;  %p592_p4 = pnand %p591_p3, %p585_p0 }
  0x1f   :  { %449 = vperm.xlu0 %570, %v439_v20   ;;  %454 = vperm.xlu1 %571, %v440_v21  }
  0x23   :  { %459 = vperm.xlu0 %570, %v441_v22   ;;  %464 = vperm.xlu1 %571, %v442_v23  }
  0x27   :  { %483 = vperm.xlu0 %570, %v480_v24  }
  0x82   :  { %v240_v26 = vpop.permute.xlu0 %239  ;;  %v216_v27 = vpop.permute.xlu1 %215 }
  0x83   :  { %v248_v43 = vrot.slane %v240_v26, %v729_v38  ;;  %v224_v48 = vrot.slane %v216_v27, %v729_v38 }
  0x86   :  { %v252_v31 = vpop.permute.xlu0 %251  ;;  %v228_v32 = vpop.permute.xlu1 %227 }
  0x87   :  { %v260_v44 = vrot.slane %v252_v31, %v729_v38  ;;  %v236_v49 = vrot.slane %v228_v32, %v729_v38 }
  0x89   :  { %v524_v55 = vcombine.low %v248_v43, %v260_v44  ;;  %v523_v60 = vcombine.low %v224_v48, %v236_v49 }
  0x8a   :  { %v192_v39 = vpop.permute.xlu0 %191  ;;  %v204_v40 = vpop.permute.xlu1 %203 }
  0x8b   :  { %v200_v45 = vrot.slane %v192_v39, %v729_v38  ;;  %v212_v46 = vrot.slane %v204_v40, %v729_v38 }
  0x8d   :  { %v522_v56 = vcombine.low %v200_v45, %v212_v46 }
  0x8e   :  { %v168_v50 = vpop.permute.xlu0 %167  ;;  %v180_v51 = vpop.permute.xlu1 %179 }
  0x8f   :  { %v176_v52 = vrot.slane %v168_v50, %v729_v38  ;;  %v188_v53 = vrot.slane %v180_v51, %v729_v38 }
  0x91   :  { %v521_v63 = vcombine.low %v176_v52, %v188_v53 }
  0x92   :  { %v376_v13 = vpop.permute.xlu0 %375  ;;  %v388_v14 = vpop.permute.xlu1 %387 }
  0x93   :  { %v384_v21 = vrot.slane %v376_v13, %v729_v38  ;;  %v396_v22 = vrot.slane %v388_v14, %v729_v38 }
  0x95   :  { %v529_v27 = vcombine.low %v384_v21, %v396_v22 }
  0x96   :  { %v400_v15 = vpop.permute.xlu0 %399  ;;  %v412_v16 = vpop.permute.xlu1 %411 }
  0x97   :  { %v408_v18 = vrot.slane %v400_v15, %v729_v38  ;;  %v420_v19 = vrot.slane %v412_v16, %v729_v38 }
  0x99   :  { %v530_v24 = vcombine.low %v408_v18, %v420_v19 }
  0x9a   :  { %v450_v34 = vpop.permute.xlu0 %449 }
  0x9e   :  { %v460_v44 = vpop.permute.xlu0 %459 }
  0xcc   :  { %v549_v33 = vpop.f32.mrf.mxu0 }
  0xce   :  { %v122_v36 = vpop.f32.mrf.mxu0 }
  0xd0   :  { %v550_v37 = vpop.f32.mrf.mxu0 }
  0xd1   :  { %v154_v57 = vpack.c.bf16 %v550_v37, %v549_v33  ;;  %v455_v37 = vpop.permute.xlu1 %454 }
  0xd2   :  { %v125_v41 = vpop.f32.mrf.mxu0 }
  0xd3   :  { %v286_v0 = vadd.bf16 %v522_v56, %v154_v57  ;;  %v153_v1 = vpack.c.bf16 %v125_v41, %v122_v36  ;;  %v484_v56 = vpop.permute.xlu0 %483 }
  0xd4   :  { %v553_v42 = vpop.f32.mrf.mxu0 }
  0xd5   :  { %v290_v6 = vmul.bf16 1045249613, %v286_v0  ;;  %v285_v7 = vadd.bf16 %v521_v63, %v153_v1 }
  0xd6   :  { %v138_v47 = vpop.f32.mrf.mxu0 }
  0xd7   :  { %v289_v9 = vmul.bf16 1045249613, %v285_v7  ;;  %v294_v10 = vmax.bf16 %v290_v6, %v286_v0 }
  0xd8   :  { %v554_v54 = vpop.f32.mrf.mxu0 }
  0xd9   :  { %v156_v58 = vpack.c.bf16 %v554_v54, %v553_v42  ;;  %v293_v11 = vmax.bf16 %v289_v9, %v285_v7  ;;  %v488_v54 = vsub.s32 0, %v726_v35 }
  0xda   :  { %v141_v59 = vpop.f32.mrf.mxu0 }
  0xdb   :  { %v288_v61 = vadd.bf16 %v524_v55, %v156_v58  ;;  %v155_v62 = vpack.c.bf16 %v141_v59, %v138_v47  ;;  %v465_v47 = vpop.permute.xlu1 %464  ;;  %v489_v58 = vrot.slane %v484_v56, %v488_v54 }
  0xdd   :  { %v287_v2 = vadd.bf16 %v523_v60, %v155_v62  ;;  %v292_v3 = vmul.bf16 1045249613, %v288_v61 }
  0xdf   :  { %v291_v4 = vmul.bf16 1045249613, %v287_v2  ;;  %v296_v5 = vmax.bf16 %v292_v3, %v288_v61 }
  0xe1   :  { %555 = vmatprep.subr.bf16.mxu1 %v296_v5  ;;  %v295_v8 = vmax.bf16 %v291_v4, %v287_v2 }
  0xe2   :  { %556 = vmatpush3.bf16.msra.mxu1 %v296_v5 }
  0xe3   :  { %557 = vmatprep.subr.bf16.mxu1 %v295_v8 }
  0xe6   :  { %558 = vmatpush3.bf16.msra.mxu1 %v295_v8 }
  0xe7   :  { %559 = vmatprep.subr.bf16.mxu1 %v294_v10 }
  0xea   :  { %560 = vmatpush3.bf16.msra.mxu1 %v294_v10 }
  0xeb   :  { %561 = vmatprep.subr.bf16.mxu1 %v293_v11 }
  0xee   :  { %562 = vmatpush3.bf16.msra.mxu1 %v293_v11 }
  0xf1   :  { %564 = vmatmul.mubr.msk.bf16.vlgmr.msra.gmra.mxu1 %vm311_vm1, %v579_v12 }
 0x1b1   :  { %v565_v17 = vpop.f32.mrf.mxu1 }
 0x1b3   :  { %v352_v20 = vpop.f32.mrf.mxu1 }
 0x1b5   :  { %v566_v23 = vpop.f32.mrf.mxu1 }
 0x1b6   :  { %v368_v25 = vpack.c.bf16 %v566_v23, %v565_v17 }
 0x1b7   :  { %v355_v26 = vpop.f32.mrf.mxu1 }
 0x1b8   :  { %v434_v28 = vadd.bf16 %v530_v24, %v368_v25  ;;  %v367_v29 = vpack.c.bf16 %v355_v26, %v352_v20 }
 0x1ba   :  { %v436_v30 = vmul.bf16 1045249613, %v434_v28  ;;  %v433_v31 = vadd.bf16 %v529_v27, %v367_v29 }
 0x1bc   :  { %v438_v32 = vmax.bf16 %v436_v30, %v434_v28  ;;  %v435_v33 = vmul.bf16 1045249613, %v433_v31 }
 0x1be   :  { %v437_v36 = vmax.bf16 %v435_v33, %v433_v31  ;;  %v445_v39 = vunpack.c.l.bf16 %v438_v32  ;;  %v446_v42 = vunpack.c.h.bf16 %v438_v32 }
 0x1c0   :  { %v443_v40 = vunpack.c.l.bf16 %v437_v36  ;;  %v444_v41 = vunpack.c.h.bf16 %v437_v36  ;;  %v469_v45 = vmul.f32 %v460_v44, %v445_v39  ;;  %v470_v48 = vmul.f32 %v465_v47, %v446_v42 }
 0x1c2   :  { %v467_v43 = vmul.f32 %v450_v34, %v443_v40  ;;  %v468_v38 = vmul.f32 %v455_v37, %v444_v41 }
 0x1c4   :  { %v471_v46 = vadd.f32 %v468_v38, %v467_v43 }
 0x1c6   :  { %v472_v49 = vadd.f32 %v471_v46, %v469_v45 }
 0x1c8   :  { %v473_v50 = vadd.f32 %v472_v49, %v470_v48 }
 0x1ca   :  { %v474_v51 = vrot.slane %v473_v50, 4 }
 0x1cc   :  { %v475_v52 = vadd.f32 %v474_v51, %v473_v50 }
 0x1ce   :  { %v476_v53 = vrot.slane %v475_v52, 2 }
 0x1d0   :  { %v477_v55 = vadd.f32 %v476_v53, %v475_v52 }
 0x1d2   :  { %v478_v57 = vrot.slane %v477_v55, 1 }
 0x1d4   :  { %v479_v59 = vadd.f32 %v478_v57, %v477_v55 }
 0x1d6   :  { %v490_v60 = vadd.f32 %v489_v58, %v479_v59 }
 0x1d8   :  { %v491_v61 = vsub.f32 0.0, %v490_v60 }
 0x1da   :  { %v492_v62 = vmul.f32 1.442695, %v491_v61 }
 0x1dc   :  { %580 = vpow2.f32 %v492_v62 }
 0x1e9   :  { %v581_v63 = vpop.eup %580 }
 0x1ea   :  { %v494_v0 = vadd.f32 1.0, %v581_v63 }
 0x1ec   :  { %582 = vrcp.f32 %v494_v0 }
 0x1f9   :  { %v583_v1 = vpop.eup %582 }
 0x1fa   :  { %496 = vst [vmem:[#allocation3] sm:$0x1] %v583_v1 }
 0x1fb   :  { %595 = shalt.err (!%p592_p4)
}
 0x1fc   :  { %506 = dma.vmem_to_hbm [thread:$0]  %s504_s20, 16, %s758_s7, [#allocation4]  }
 0x1fd   :  { %604 = dma.done.wait [#allocation4], 16  }
 0x1fe   :  { %605 = vsyncadd [#allocation4], 4294967280 }
 0x1ff   :  { %510 = vsyncpa [#allocation4], 1 }

</bundles_post_ra>
